<compile_context>
chip_gen: v6e
topology: v6e:2x2x1
jax: 0.10.0
libtpu: 0.0.40
codegen_flags: <defaults>
</compile_context>

<pallas_src>
import jax
import jax.numpy as jnp
from jax.experimental import pallas as pl
from jax.experimental.pallas import tpu as pltpu


_LANE_CAP = 65536               # lanes per tile (safe on v7x 64 MiB VMEM)
_TARGET_BLOCK_BYTES = 2 << 20   # aim ~2 MiB z block per grid step


def _vq_kernel(z_ref, zq_ref, idx_ref):
    """One (batch-block, lane-tile) block.

    z_ref:   (bb, n, tl) f32  -- encoder output, channel-major (native NCHW slab)
    zq_ref:  (bb, n, tl)      -- one-hot along channels (== one_hot @ eye(n))
    idx_ref: (bb, 1, tl) i32  -- argmax channel index per spatial position
    """
    z = z_ref[...]                                              # (bb, n, tl)
    n = z.shape[1]
    ch = jax.lax.broadcasted_iota(jnp.int32, z.shape, 1)        # channel id (sublane axis)

    # argmax over the channel (sublane) axis, first occurrence on ties
    # (matches torch CPU tie-break).
    zmax = jnp.max(z, axis=1, keepdims=True)                    # (bb, 1, tl) XLU reduce
    masked_ch = jnp.where(z == zmax, ch, n)                     # n where not a max
    idx = jnp.min(masked_ch, axis=1, keepdims=True)             # (bb, 1, tl) i32
    idx_ref[...] = idx

    # Strict first-occurrence one-hot, reusing masked_ch (embedding == eye(n),
    # so this IS z_q -- the matmul is skipped).
    zq_ref[...] = (masked_ch == idx).astype(zq_ref.dtype)


def _pick_tile(hw, cap=_LANE_CAP):
    """Lane tile: full row when it fits, else the largest mult-of-128 divisor <= cap."""
    if hw <= cap:
        return hw                       # block dim == full array dim: always legal
    start = cap - (cap % 128)
    for d in range(start, 0, -128):     # largest multiple-of-128 divisor of hw <= cap
        if hw % d == 0:
            return d
    # Pathological hw (> cap, no mult-of-128 divisor): fall back to a full row.
    return hw


def _pick_batch_block(batch, row_bytes, target=_TARGET_BLOCK_BYTES):
    """Fold batch rows until the z block is ~target bytes (bb must divide batch)."""
    bb = max(1, min(batch, target // max(row_bytes, 1)))
    while batch % bb:
        bb -= 1
    return bb


def vector_quantizer(z_nchw, *, tl=None, zq_dtype=None):
    """z_nchw: (B, C, H, W) with C == n embeddings.

    Returns (z_q (B, C, H, W), indices (B*H*W, 1) int32).
    """
    B, C, H, W = z_nchw.shape
    n = C
    HW = H * W
    z_cm = z_nchw.reshape(B, n, HW)            # free: NCHW is already channel-major

    if zq_dtype is None:
        zq_dtype = z_cm.dtype                  # match the module's output dtype
    if tl is None:
        tl = _pick_tile(HW)
    assert HW % tl == 0 and (tl % 128 == 0 or tl == HW)

    itemsize = jnp.dtype(z_cm.dtype).itemsize
    bb = _pick_batch_block(B, n * tl * itemsize)
    grid = (B // bb, HW // tl)

    # Double-buffered VMEM footprint; the (bb,1,tl) i32 idx block pads to 8 sublanes.
    z_blk = bb * n * tl * itemsize
    zq_blk = bb * n * tl * jnp.dtype(zq_dtype).itemsize
    idx_blk = bb * 8 * tl * 4
    live = 2 * (z_blk + zq_blk + idx_blk)
    vmem_limit = int(min(48 << 20, max(live + (4 << 20), 16 << 20)))

    zq_cm, idx_cm = pl.pallas_call(
        _vq_kernel,
        out_shape=(
            jax.ShapeDtypeStruct((B, n, HW), zq_dtype),
            jax.ShapeDtypeStruct((B, 1, HW), jnp.int32),
        ),
        grid_spec=pltpu.PrefetchScalarGridSpec(
            num_scalar_prefetch=0,
            grid=grid,
            in_specs=[
                pl.BlockSpec((bb, n, tl), lambda b, j: (b, 0, j)),   # z slab
            ],
            out_specs=[
                pl.BlockSpec((bb, n, tl), lambda b, j: (b, 0, j)),   # z_q (lane-dense)
                pl.BlockSpec((bb, 1, tl), lambda b, j: (b, 0, j)),   # idx (lane-dense)
            ],
        ),
        compiler_params=pltpu.CompilerParams(
            dimension_semantics=("parallel", "parallel"),
            vmem_limit_bytes=vmem_limit,
        ),
    )(z_cm)

    # Free, contiguous reshapes back to the module's output shapes.
    z_q = zq_cm.reshape(B, n, H, W)            # already NCHW
    indices = idx_cm.reshape(B * HW, 1)        # (b, h, w)-major flattening, as in torch
    return z_q, indices


if __name__ == "__main__":
    # Small shapes consistent with the module: channel dim == n embeddings.
    B, n, H, W = 2, 8, 16, 16
    key = jax.random.PRNGKey(0)
    z = jax.random.normal(key, (B, n, H, W), dtype=jnp.float32)

    # Module __init__: embedding = eye(n) (used only by the reference check;
    # the kernel exploits the identity so z_q == one_hot).
    embedding = jnp.eye(n, dtype=jnp.float32)

    z_q, indices = vector_quantizer(z)
    z_q = jax.block_until_ready(z_q)
    indices = jax.block_until_ready(indices)

    # Pure-JAX reference check (mirrors the PyTorch forward).
    z_nhwc = jnp.transpose(z, (0, 2, 3, 1)).reshape(-1, n)
    ref_idx = jnp.argmax(z_nhwc, axis=1).astype(jnp.int32)[:, None]
    ref_zq_flat = jax.nn.one_hot(ref_idx[:, 0], n, dtype=jnp.float32) @ embedding
    ref_zq = jnp.transpose(ref_zq_flat.reshape(B, H, W, n), (0, 3, 1, 2))

    assert z_q.shape == (B, n, H, W)
    assert indices.shape == (B * H * W, 1)
    assert jnp.array_equal(indices, ref_idx)
    assert jnp.allclose(z_q.astype(jnp.float32), ref_zq)

    print("KERNEL_OK")
</pallas_src>

<mosaic_0001>
module attributes {stable_mosaic.version = 11 : i64} {
  func.func @_vq_kernel(%arg0: i32, %arg1: i32, %arg2: memref<2x8x256xf32, #tpu.memory_space<vmem>>, %arg3: memref<2x8x256xf32, #tpu.memory_space<vmem>>, %arg4: memref<2x1x256xi32, #tpu.memory_space<vmem>>) attributes {dimension_semantics = [#tpu.dimension_semantics<parallel>, #tpu.dimension_semantics<parallel>], iteration_bounds = array<i64: 1, 1>, scalar_prefetch = 0 : i64, scratch_operands = 0 : i64, tpu.core_type = #tpu.core_type<tc>, window_params = [{transform_indices = @transform_0, window_bounds = array<i64: 2, 8, 256>}, {transform_indices = @transform_1, window_bounds = array<i64: 2, 8, 256>}, {transform_indices = @transform_2, window_bounds = array<i64: 2, 1, 256>}]} {
    %c0 = arith.constant 0 : index
    %c0_0 = arith.constant 0 : index
    %c0_1 = arith.constant 0 : index
    %0 = vector.load %arg2[%c0, %c0_0, %c0_1] : memref<2x8x256xf32, #tpu.memory_space<vmem>>, vector<2x8x256xf32>
    %1 = tpu.iota {dimensions = array<i32: 1>} : vector<2x8x256xi32>
    %cst = arith.constant dense<0xFF800000> : vector<2x256xf32>
    %2 = vector.multi_reduction <maximumf>, %0, %cst [1] : vector<2x8x256xf32> to vector<2x256xf32>
    %3 = vector.shape_cast %2 : vector<2x256xf32> to vector<2x1x256xf32>
    %4 = vector.broadcast %3 : vector<2x1x256xf32> to vector<2x8x256xf32>
    %5 = arith.cmpf oeq, %0, %4 : vector<2x8x256xf32>
    %c8_i32 = arith.constant 8 : i32
    %6 = vector.broadcast %c8_i32 : i32 to vector<2x8x256xi32>
    %7 = arith.select %5, %1, %6 : vector<2x8x256xi1>, vector<2x8x256xi32>
    %cst_2 = arith.constant dense<2147483647> : vector<2x256xi32>
    %8 = vector.multi_reduction <minsi>, %7, %cst_2 [1] : vector<2x8x256xi32> to vector<2x256xi32>
    %9 = vector.shape_cast %8 : vector<2x256xi32> to vector<2x1x256xi32>
    %c0_3 = arith.constant 0 : index
    %c0_4 = arith.constant 0 : index
    %c0_5 = arith.constant 0 : index
    %10 = vector.load %arg4[%c0_3, %c0_4, %c0_5] : memref<2x1x256xi32, #tpu.memory_space<vmem>>, vector<2x1x256xi32>
    tpu.vector_store %arg4[%c0_3, %c0_4, %c0_5], %9 {strides = array<i32>} : memref<2x1x256xi32, #tpu.memory_space<vmem>>, vector<2x1x256xi32>,
    %11 = vector.broadcast %9 : vector<2x1x256xi32> to vector<2x8x256xi32>
    %12 = arith.cmpi eq, %7, %11 : vector<2x8x256xi32>
    %13 = arith.extui %12 : vector<2x8x256xi1> to vector<2x8x256xi32>
    %14 = arith.sitofp %13 : vector<2x8x256xi32> to vector<2x8x256xf32>
    %c0_6 = arith.constant 0 : index
    %c0_7 = arith.constant 0 : index
    %c0_8 = arith.constant 0 : index
    %15 = vector.load %arg3[%c0_6, %c0_7, %c0_8] : memref<2x8x256xf32, #tpu.memory_space<vmem>>, vector<2x8x256xf32>
    tpu.vector_store %arg3[%c0_6, %c0_7, %c0_8], %14 {strides = array<i32>} : memref<2x8x256xf32, #tpu.memory_space<vmem>>, vector<2x8x256xf32>,
    return
  }
  func.func @transform_0(%arg0: i32, %arg1: i32) -> (i32, i32, i32) {
    %c0_i32 = arith.constant 0 : i32
    %c0_i32_0 = arith.constant 0 : i32
    return %arg0, %c0_i32, %arg1 : i32, i32, i32
  }
  func.func @transform_1(%arg0: i32, %arg1: i32) -> (i32, i32, i32) {
    %c0_i32 = arith.constant 0 : i32
    %c0_i32_0 = arith.constant 0 : i32
    return %arg0, %c0_i32, %arg1 : i32, i32, i32
  }
  func.func @transform_2(%arg0: i32, %arg1: i32) -> (i32, i32, i32) {
    %c0_i32 = arith.constant 0 : i32
    %c0_i32_0 = arith.constant 0 : i32
    return %arg0, %c0_i32, %arg1 : i32, i32, i32
  }
}

</mosaic_0001>

<bundles_post_ra>
// kernel: tpu_custom_call.1
= control target key start
LH: loop header
LB: loop body
LE: loop exit
PB: predicated region body
PF: predicated region fallthrough
CT: control target
= control target key end

     0   :  { %8 = vsyncpa [#allocation3], 0  ;;  %s313_s0 = inlined_call_operand.hbm [shape: f32[2,8,256], index: 0, kind: input, shape index: {}]   ;;  %s314_s1 = inlined_call_operand.hbm [shape: f32[2,8,256], index: 1, kind: output, shape index: {0}]   ;;  %s315_s2 = inlined_call_operand.hbm [shape: s32[2,1,256], index: 2, kind: output, shape index: {1}]  }
   0x1   :  { %9 = vsyncpa [#allocation4], 0 }
   0x2   :  { %10 = vsyncpa [#allocation7], 0  ;;  %s264_s9 = smov [#allocation2]  }
   0x3   :  { %s16_s10 = sshll.u32 %s264_s9, 4  ;;  %s17_s10 = int_to_ptr.vmem [resolvable:$true] %s16_s10 }
   0x4   :  { %s206_s11 = scalar_lea.vmem %s17_s10, 512  ;;  %p211_p1 = scmp.lt.s32.totalorder %s17_s10, %s17_s10 }
   0x5   :  { %p207_p0 = scmp.ne.s32.totalorder %s17_s10, %s206_s11  ;;  %p212_p2 = scmp.lt.s32.totalorder %s206_s11, %s206_s11 }
   0x7   :  { %p213_p3 = por %p212_p2, %p211_p1 }
   0x9   :  { %p214_p4 = pnand %p213_p3, %p207_p0 }
   0xb   :  { %217 = shalt.err (!%p214_p4)
}
   0xc   :  { %s265_s12 = smov 256   ;;  %s266_s13 = smov 16  }
   0xd   :  { %22 = dma.hbm_to_vmem [thread:$0]  %s313_s0, 512, %s17_s10, [#allocation3], %s265_s12, %s265_s12, %s266_s13  }
   0xe   :  { %258 = dma.done.wait [#allocation3], 512  }
   0xf   :  { %259 = vsyncadd [#allocation3], 4294966784  ;;  %v26_v0 = vld [vmem:[#allocation2] sm:$0xff]  ;;  %v27_v1 = vld [vmem:[#allocation2 + $0x8] sm:$0xff]  ;;  %v30_v15 = vlaneseq  ;;  %v267_v38 = vmov 1966171168  }
  0x10   :  { %v28_v2 = vld [vmem:[#allocation2 + $0x10] sm:$0xff]  ;;  %v32_v3 = vrot.slane %v26_v0, 4  ;;  %v38_v4 = vrot.slane %v27_v1, 4  ;;  %v29_v5 = vld [vmem:[#allocation2 + $0x18] sm:$0xff]  ;;  %v102_v39 = vunpack.c.l.s4 %v267_v38  ;;  %s268_s0 = smov [#allocation5]   ;;  %s269_s17 = smov [#allocation6]  }
  0x11   :  { %v44_v6 = vrot.slane %v28_v2, 4  ;;  %v50_v7 = vrot.slane %v29_v5, 4  ;;  %v31_v24 = vshrl.u32 %v30_v15, 7  ;;  %s157_s16 = sshll.u32 %s268_s0, 4  ;;  %s169_s18 = sshll.u32 %s269_s17, 4  ;;  %s158_s16 = int_to_ptr.vmem [resolvable:$true] %s157_s16  ;;  %s170_s18 = int_to_ptr.vmem [resolvable:$true] %s169_s18 }
  0x12   :  { %v33_v8 = vmax.f32 %v26_v0, %v32_v3  ;;  %v39_v9 = vmax.f32 %v27_v1, %v38_v4  ;;  %v103_v48 = vunpack.c.0.s8 %v102_v39  ;;  %s218_s19 = scalar_lea.vmem %s158_s16, 512  ;;  %p223_p6 = scmp.lt.s32.totalorder %s158_s16, %s158_s16 }
  0x13   :  { %v45_v10 = vmax.f32 %v28_v2, %v44_v6  ;;  %v51_v11 = vmax.f32 %v29_v5, %v50_v7  ;;  %p219_p5 = scmp.ne.s32.totalorder %s158_s16, %s218_s19  ;;  %p224_p7 = scmp.lt.s32.totalorder %s218_s19, %s218_s19 }
  0x14   :  { %v34_v12 = vrot.slane %v33_v8, 2  ;;  %v40_v13 = vrot.slane %v39_v9, 2  ;;  %v106_v57 = vsub.s32 %v103_v48, %v31_v24 }
  0x15   :  { %v46_v14 = vrot.slane %v45_v10, 2  ;;  %v52_v16 = vrot.slane %v51_v11, 2  ;;  %p225_p8 = por %p224_p7, %p223_p6 }
  0x16   :  { %v35_v17 = vmax.f32 %v33_v8, %v34_v12  ;;  %v41_v18 = vmax.f32 %v39_v9, %v40_v13 }
  0x17   :  { %v47_v19 = vmax.f32 %v45_v10, %v46_v14  ;;  %v53_v20 = vmax.f32 %v51_v11, %v52_v16  ;;  %p226_p9 = pnand %p225_p8, %p219_p5 }
  0x18   :  { %v36_v21 = vrot.slane %v35_v17, 1  ;;  %v42_v22 = vrot.slane %v41_v18, 1 }
  0x19   :  { %v48_v23 = vrot.slane %v47_v19, 1  ;;  %v54_v25 = vrot.slane %v53_v20, 1 }
  0x1a   :  { %v37_v26 = vmax.f32 %v35_v17, %v36_v21  ;;  %v43_v27 = vmax.f32 %v41_v18, %v42_v22 }
  0x1b   :  { %v49_v28 = vmax.f32 %v47_v19, %v48_v23  ;;  %v55_v29 = vmax.f32 %v53_v20, %v54_v25 }
  0x1c   :  { %vm56_vm0 = vcmp.eq.f32.partialorder %v26_v0, %v37_v26  ;;  %vm57_vm1 = vcmp.eq.f32.partialorder %v27_v1, %v43_v27  ;;  %v270_v0 = vmov 0.0  }
  0x1d   :  { %vm58_vm2 = vcmp.eq.f32.partialorder %v28_v2, %v49_v28  ;;  %v60_v30 = vsel %vm56_vm0, %v31_v24, 8  ;;  %v61_v31 = vsel %vm57_vm1, %v31_v24, 8  ;;  %vm59_vm3 = vcmp.eq.f32.partialorder %v29_v5, %v55_v29 }
  0x1e   :  { %v62_v32 = vsel %vm58_vm2, %v31_v24, 8  ;;  %v64_v33 = vrot.slane %v60_v30, 4  ;;  %v73_v34 = vrot.slane %v61_v31, 4  ;;  %v63_v35 = vsel %vm59_vm3, %v31_v24, 8 }
  0x1f   :  { %v82_v36 = vrot.slane %v62_v32, 4  ;;  %v91_v37 = vrot.slane %v63_v35, 4 }
  0x20   :  { %vm65_vm4 = vcmp.lt.s32.totalorder %v60_v30, %v64_v33  ;;  %vm74_vm5 = vcmp.lt.s32.totalorder %v61_v31, %v73_v34 }
  0x21   :  { %vm83_vm6 = vcmp.lt.s32.totalorder %v62_v32, %v82_v36  ;;  %v66_v40 = vsel %vm65_vm4, %v60_v30, %v64_v33  ;;  %v75_v41 = vsel %vm74_vm5, %v61_v31, %v73_v34  ;;  %vm92_vm7 = vcmp.lt.s32.totalorder %v63_v35, %v91_v37 }
  0x22   :  { %v84_v42 = vsel %vm83_vm6, %v62_v32, %v82_v36  ;;  %v67_v43 = vrot.slane %v66_v40, 2  ;;  %v76_v44 = vrot.slane %v75_v41, 2  ;;  %v93_v46 = vsel %vm92_vm7, %v63_v35, %v91_v37 }
  0x23   :  { %v85_v45 = vrot.slane %v84_v42, 2  ;;  %v94_v47 = vrot.slane %v93_v46, 2  ;;  %vm296_vm4 = vcmp.lt.s32.totalorder %v30_v15, 256 }
  0x24   :  { %vm68_vm8 = vcmp.lt.s32.totalorder %v66_v40, %v67_v43  ;;  %vm77_vm9 = vcmp.lt.s32.totalorder %v75_v41, %v76_v44 }
  0x25   :  { %vm86_vm10 = vcmp.lt.s32.totalorder %v84_v42, %v85_v45  ;;  %v69_v49 = vsel %vm68_vm8, %v66_v40, %v67_v43  ;;  %v78_v50 = vsel %vm77_vm9, %v75_v41, %v76_v44  ;;  %vm95_vm11 = vcmp.lt.s32.totalorder %v93_v46, %v94_v47 }
  0x26   :  { %v87_v51 = vsel %vm86_vm10, %v84_v42, %v85_v45  ;;  %v70_v52 = vrot.slane %v69_v49, 1  ;;  %v79_v53 = vrot.slane %v78_v50, 1  ;;  %v96_v55 = vsel %vm95_vm11, %v93_v46, %v94_v47 }
  0x27   :  { %v88_v54 = vrot.slane %v87_v51, 1  ;;  %v97_v56 = vrot.slane %v96_v55, 1 }
  0x28   :  { %vm71_vm12 = vcmp.lt.s32.totalorder %v69_v49, %v70_v52  ;;  %vm80_vm13 = vcmp.lt.s32.totalorder %v78_v50, %v79_v53 }
  0x29   :  { %vm89_vm14 = vcmp.lt.s32.totalorder %v87_v51, %v88_v54  ;;  %v72_v58 = vsel %vm71_vm12, %v69_v49, %v70_v52  ;;  %v81_v59 = vsel %vm80_vm13, %v78_v50, %v79_v53  ;;  %vm98_vm15 = vcmp.lt.s32.totalorder %v96_v55, %v97_v56 }
  0x2a   :  { %v90_v60 = vsel %vm89_vm14, %v87_v51, %v88_v54  ;;  %v100_v61 = vcombine.low %v72_v58, %v81_v59  ;;  %v99_v62 = vsel %vm98_vm15, %v96_v55, %v97_v56  ;;  %vm136_vm0 = vcmp.eq.s32.totalorder %v60_v30, %v72_v58 }
  0x2b   :  { %vm137_vm1 = vcmp.eq.s32.totalorder %v61_v31, %v81_v59  ;;  %v115_v63 = vcombine.low %v90_v60, %v99_v62  ;;  %v185_v1 = vsel %vm136_vm0, 1.0, %v270_v0  ;;  %vm138_vm2 = vcmp.eq.s32.totalorder %v62_v32, %v90_v60 }
  0x2c   :  { %v186_v2 = vsel %vm137_vm1, 1.0, %v270_v0  ;;  %v107_v3 = vrot.slane %v100_v61, %v106_v57  ;;  %148 = vst [vmem:[#allocation5] sm:$0xff] %v185_v1  ;;  %v187_v4 = vsel %vm138_vm2, 1.0, %v270_v0  ;;  %vm139_vm3 = vcmp.eq.s32.totalorder %v63_v35, %v99_v62 }
  0x2d   :  { %149 = vst [vmem:[#allocation5 + $0x8] sm:$0xff] %v186_v2  ;;  %v122_v6 = vrot.slane %v115_v63, %v106_v57  ;;  %150 = vst [vmem:[#allocation5 + $0x10] sm:$0xff] %v187_v4  ;;  %v188_v7 = vsel %vm139_vm3, 1.0, %v270_v0 }
  0x2e   :  { %v114_v8 = vrot.slane %v107_v3, %v106_v57  ;;  %151 = vst [vmem:[#allocation5 + $0x18] sm:$0xff] %v188_v7 }
  0x2f   :  { %v129_v9 = vrot.slane %v122_v6, %v106_v57 }
  0x30   :  { %229 = shalt.err (!%p226_p9)
}
  0x31   :  { %163 = dma.vmem_to_hbm [thread:$0]  %s158_s16, 512, %s314_s1, [#allocation4], %s265_s12, %s265_s12, %s266_s13   ;;  %134 = vst.msk [vmem:[#allocation6] sm:$0x3] %vm296_vm4, %v114_v8  ;;  %135 = vst.msk [vmem:[#allocation6 + $0x2] sm:$0x3] %vm296_vm4, %v129_v9 }
  0x32   :  { %s238_s22 = scalar_lea.vmem %s170_s18, 64  ;;  %p243_p11 = scmp.lt.s32.totalorder %s170_s18, %s170_s18 }
  0x33   :  { %p239_p10 = scmp.ne.s32.totalorder %s170_s18, %s238_s22  ;;  %p244_p12 = scmp.lt.s32.totalorder %s238_s22, %s238_s22 }
  0x35   :  { %p245_p13 = por %p244_p12, %p243_p11 }
  0x37   :  { %p246_p0 = pnand %p245_p13, %p239_p10 }
  0x39   :  { %249 = shalt.err (!%p246_p0)
}
  0x3a   :  { %s271_s23 = smov 32   ;;  %s272_s24 = smov 2  }
  0x3b   :  { %175 = dma.vmem_to_hbm [thread:$0]  %s170_s18, 64, %s315_s2, [#allocation7], %s271_s23, %s271_s23, %s272_s24  }
  0x3c   :  { %260 = dma.done.wait [#allocation4], 512  }
  0x3d   :  { %261 = vsyncadd [#allocation4], 4294966784 }
  0x3e   :  { %262 = dma.done.wait [#allocation7], 64  }
  0x3f   :  { %263 = vsyncadd [#allocation7], 4294967232 }
  0x40   :  { %182 = vsyncpa [#allocation3], 1 }
  0x41   :  { %183 = vsyncpa [#allocation4], 1 }
  0x42   :  { %184 = vsyncpa [#allocation7], 1 }

</bundles_post_ra>
